<compile_context>
chip_gen: v6e
topology: v6e:2x2x1
jax: 0.10.0
libtpu: 0.0.40
codegen_flags: <defaults>
</compile_context>

<pallas_src>
import math

import jax
import jax.numpy as jnp
from jax.experimental import pallas as pl
from jax.experimental.pallas import tpu as pltpu

# ----------------------------- problem sizes -------------------------------
F_DIM = 128          # feature_dim
H_DIM = 256          # hidden_dim
V_DIM = 128          # visual_dim
H2_DIM = H_DIM // 2  # diffusion_net hidden (== F_DIM here, needed for packing)
N_NODES = 16         # number of graph nodes (fixed capacity)
N_EDGES = 24
LN_EPS = 1e-5

assert H2_DIM == F_DIM, "packing of diffusion params assumes hidden_dim//2 == feature_dim"


def _ln(x, gamma, beta):
    """PyTorch-style LayerNorm over the last axis (biased variance), f32 stats."""
    mu = jnp.mean(x, axis=-1, keepdims=True)
    var = jnp.mean((x - mu) ** 2, axis=-1, keepdims=True)
    return (x - mu) * jax.lax.rsqrt(var + LN_EPS) * gamma + beta


# ============================== Pallas kernels ==============================
def encoder_kernel(obs_ref, fw1_ref, fw2_ref, cw_ref, pH_ref, pF_ref,
                   feat_ref, ctx_ref):
    """feature_encoder (Linear-LN-ReLU-Linear-LN) + context_encoder (Linear-LN)."""
    pH = pH_ref[...]                      # (8, H)  packed: fe_b1, fe_g1, fe_be1
    pF = pF_ref[...]                      # (8, F)  packed: fe_b2,g2,be2, ce_b,g,be
    fb1, fg1, fbe1 = pH[0:1], pH[1:2], pH[2:3]
    fb2, fg2, fbe2 = pF[0:1], pF[1:2], pF[2:3]
    cb, cg, cbe = pF[3:4], pF[4:5], pF[5:6]

    x = obs_ref[...].astype(jnp.bfloat16)                              # (B, V)
    h = jnp.dot(x, fw1_ref[...], preferred_element_type=jnp.float32) + fb1
    h = jnp.maximum(_ln(h, fg1, fbe1), 0.0)
    f = jnp.dot(h.astype(jnp.bfloat16), fw2_ref[...],
                preferred_element_type=jnp.float32) + fb2
    feat_ref[...] = _ln(f, fg2, fbe2)

    c = jnp.dot(x, cw_ref[...], preferred_element_type=jnp.float32) + cb
    ctx_ref[...] = _ln(c, cg, cbe)


def make_fused_rk4_kernel(num_steps):
    """Whole-integration kernel: weights resident in VMEM, state in VMEM scratch."""

    def kernel(dt_ref,                                   # SMEM (1,) f32
               state_ref, ctx_ref, lap_ref,              # VMEM blocks
               w1a_ref, w1b_ref, w2_ref, w3_ref, dw1_ref,
               pH_ref, pF_ref,
               out_ref, h_scr):
        dt = dt_ref[0]

        # packed small params (f32)
        pH = pH_ref[...]                                  # (8, H)
        pF = pF_ref[...]                                  # (8, F)
        b1, g1, be1 = pH[0:1], pH[1:2], pH[2:3]
        b2, g2, be2 = pH[3:4], pH[4:5], pH[5:6]
        b3 = pF[0:1]
        db1 = pF[1:2]
        dw2_row = pF[2:3]                                 # diffusion second layer as row
        db2 = pF[3:4, 0:1]                                # (1,1) scalar bias

        # weights resident in VMEM for the whole integration (bf16 MXU path)
        w1a = w1a_ref[...]
        w2 = w2_ref[...]
        w3 = w3_ref[...]
        dw1 = dw1_ref[...]
        L = lap_ref[...].astype(jnp.bfloat16)             # (N, N)

        # hoisted: context projection is constant over the whole integration
        ctx_proj = jnp.dot(ctx_ref[...].astype(jnp.bfloat16), w1b_ref[...],
                           preferred_element_type=jnp.float32) + b1      # (1, H)

        def f(s_f32):                                     # s_f32: (N, F) f32
            s = s_f32.astype(jnp.bfloat16)
            # temporal_dynamics(concat([state, context], -1)) with split matmul
            h = jnp.dot(s, w1a, preferred_element_type=jnp.float32) + ctx_proj
            h = jnp.maximum(_ln(h, g1, be1), 0.0)
            h = jnp.dot(h.astype(jnp.bfloat16), w2,
                        preferred_element_type=jnp.float32) + b2
            h = jnp.maximum(_ln(h, g2, be2), 0.0)
            temporal = jnp.dot(h.astype(jnp.bfloat16), w3,
                               preferred_element_type=jnp.float32) + b3
            # diffusion_net: Linear -> ReLU -> (row-weighted sum) -> Sigmoid
            dh = jnp.maximum(jnp.dot(s, dw1, preferred_element_type=jnp.float32)
                             + db1, 0.0)
            d = jax.nn.sigmoid(jnp.sum(dh * dw2_row, axis=-1, keepdims=True) + db2)
            # spatial diffusion term: diffusion_coeffs * (L @ state)
            Lh = jnp.dot(L, s, preferred_element_type=jnp.float32)
            return temporal - d * Lh

        h_scr[...] = state_ref[0]                          # (N, F) f32

        def rk4_step(_, carry):
            h = h_scr[...]
            k1 = f(h)
            k2 = f(h + (0.5 * dt) * k1)
            k3 = f(h + (0.5 * dt) * k2)
            k4 = f(h + dt * k3)
            h_scr[...] = h + (dt / 6.0) * (k1 + 2.0 * k2 + 2.0 * k3 + k4)
            return carry

        jax.lax.fori_loop(0, num_steps, rk4_step, 0)
        out_ref[0] = h_scr[...]

    return kernel


# ============================== Pallas wrappers =============================
def encode_pallas(params, observation):
    B = observation.shape[0]
    args = [observation, params['enc_fw1'], params['enc_fw2'], params['enc_cw'],
            params['enc_pH'], params['enc_pF']]
    in_specs = [pl.BlockSpec(a.shape, lambda i: (0, 0)) for a in args]   # all 2D
    out_specs = (pl.BlockSpec((B, F_DIM), lambda i: (0, 0)),
                 pl.BlockSpec((B, F_DIM), lambda i: (0, 0)))
    feat, ctx = pl.pallas_call(
        encoder_kernel,
        grid=(1,),
        in_specs=in_specs,
        out_specs=out_specs,
        out_shape=(jax.ShapeDtypeStruct((B, F_DIM), jnp.float32),
                   jax.ShapeDtypeStruct((B, F_DIM), jnp.float32)),
    )(*args)
    return feat, ctx


def evolve_state_pallas(params, state, context, laplacian, t0, t1, num_steps=8):
    """Integrate dh/dt over [t0, t1] with fixed-step RK4, fully inside one kernel.

    TODO(synk): reference uses adaptive dopri5 (torchdiffeq); replaced with
    fixed-step RK4 (num_steps configurable).
    """
    B, N, F = state.shape
    dt = jnp.asarray((t1 - t0) / num_steps, jnp.float32).reshape(1)

    weights = [params['ode_w1a'], params['ode_w1b'], params['ode_w2'],
               params['ode_w3'], params['ode_dw1'],
               params['ode_pH'], params['ode_pF']]

    in_specs = ([pl.BlockSpec(memory_space=pltpu.MemorySpace.SMEM)] +     # dt scalar
                [pl.BlockSpec((1, N, F), lambda b: (b, 0, 0)),            # state
                 pl.BlockSpec((1, F), lambda b: (b, 0)),                  # context
                 pl.BlockSpec((N, N), lambda b: (0, 0))] +                # Laplacian
                [pl.BlockSpec(w.shape, lambda b: (0, 0)) for w in weights])
    out_spec = pl.BlockSpec((1, N, F), lambda b: (b, 0, 0))

    return pl.pallas_call(
        make_fused_rk4_kernel(num_steps),
        grid=(B,),
        in_specs=in_specs,
        out_specs=out_spec,
        out_shape=jax.ShapeDtypeStruct((B, N, F), jnp.float32),
        scratch_shapes=[pltpu.VMEM((N, F), jnp.float32)],
        compiler_params=pltpu.CompilerParams(dimension_semantics=("parallel",)),
    )(dt, state, context, laplacian, *weights)


# ============================== plain-JAX glue ==============================
def graph_laplacian(params, edge_index, edge_attr, num_nodes):
    """GraphLaplacian.forward: normalized Laplacian I - D^-1/2 A D^-1/2.

    TODO(synk): scatter-based degree / to_dense_adj has no clean Pallas
    equivalent on TPU; edge_weight_net + Laplacian assembly stay in plain JAX.
    Degree counts edges (unweighted), matching torch_geometric.utils.degree.
    """
    h = jnp.maximum(edge_attr @ params['ew_w1'] + params['ew_b1'], 0.0)
    ew = jax.nn.sigmoid(h @ params['ew_w2'] + params['ew_b2'])[:, 0]
    loops = jnp.arange(num_nodes, dtype=edge_index.dtype)
    ei = jnp.concatenate([edge_index, jnp.stack([loops, loops])], axis=1)
    ew = jnp.concatenate([ew, jnp.ones((num_nodes,), ew.dtype)])
    row, col = ei[0], ei[1]
    deg = jnp.zeros((num_nodes,), ew.dtype).at[col].add(jnp.ones_like(ew))
    dis = jnp.where(deg > 0, 1.0 / jnp.sqrt(deg), 0.0)
    ewn = dis[row] * ew * dis[col]
    adj = jnp.zeros((num_nodes, num_nodes), ew.dtype).at[row, col].add(ewn)
    return jnp.eye(num_nodes, dtype=ew.dtype) - adj


def forward(params, graph_state, observation, position, current_time, num_steps=8):
    """SpatialMemoryGraphODE.forward (fixed-capacity graph state)."""
    obs_features, context = encode_pallas(params, observation)       # (1,F),(1,F)

    node_features = graph_state['node_features']                     # (N, F)
    num_nodes = node_features.shape[0]

    lap = graph_laplacian(params, graph_state['edge_index'],
                          graph_state['edge_attr'], num_nodes)
    state = node_features[None]                                      # (1, N, F)

    # TODO(synk): Python-level branch mirrors the reference; under jax.jit this
    # would need lax.cond (times would become traced values).
    if current_time > graph_state['last_update_time']:
        evolved = evolve_state_pallas(params, state, context, lap,
                                      graph_state['last_update_time'],
                                      current_time, num_steps=num_steps)[0]
    else:
        evolved = node_features

    # find_or_create_node -> nearest existing node (fixed-capacity graph).
    # TODO(synk): node-creation branch needs dynamic graph growth (stateful,
    # dynamic shapes) and SpatialMemoryGraphState is not provided; only the
    # nearest-node path is implemented.
    d2 = jnp.sum((graph_state['node_positions'] - position[None, :]) ** 2, axis=-1)
    node_idx = jnp.argmin(d2)

    alpha = 0.7
    blended = (1.0 - alpha) * evolved[node_idx] + alpha * obs_features[0]
    new_features = evolved.at[node_idx].set(blended)

    # TODO(synk): graph_state.update_edges(self.edge_predictor) is undefined in
    # the reference; edge_predictor parameters are initialized but unused.

    query_features = new_features[node_idx]
    new_state = dict(graph_state, node_features=new_features,
                     last_update_time=current_time)
    return new_state, query_features


# ============================== parameter init ==============================
def init_params(key):
    keys = list(jax.random.split(key, 16))
    k = iter(keys)

    def lin(shape):
        fan_in = shape[0]
        return jax.random.normal(next(k), shape, jnp.float32) / math.sqrt(fan_in)

    p = {}
    # feature_encoder: Linear(V,H) LN(H) ReLU Linear(H,F) LN(F)
    p['fe_w1'] = lin((V_DIM, H_DIM)); p['fe_b1'] = jnp.zeros((1, H_DIM), jnp.float32)
    p['fe_g1'] = jnp.ones((1, H_DIM), jnp.float32); p['fe_be1'] = jnp.zeros((1, H_DIM), jnp.float32)
    p['fe_w2'] = lin((H_DIM, F_DIM)); p['fe_b2'] = jnp.zeros((1, F_DIM), jnp.float32)
    p['fe_g2'] = jnp.ones((1, F_DIM), jnp.float32); p['fe_be2'] = jnp.zeros((1, F_DIM), jnp.float32)
    # context_encoder: Linear(V,F) LN(F)
    p['ce_w'] = lin((V_DIM, F_DIM)); p['ce_b'] = jnp.zeros((1, F_DIM), jnp.float32)
    p['ce_g'] = jnp.ones((1, F_DIM), jnp.float32); p['ce_be'] = jnp.zeros((1, F_DIM), jnp.float32)
    # temporal_dynamics: Linear(2F,H) LN ReLU Linear(H,H) LN ReLU Linear(H,F)
    p['td_w1a'] = lin((F_DIM, H_DIM)); p['td_w1b'] = lin((F_DIM, H_DIM))
    p['td_b1'] = jnp.zeros((1, H_DIM), jnp.float32)
    p['td_g1'] = jnp.ones((1, H_DIM), jnp.float32); p['td_be1'] = jnp.zeros((1, H_DIM), jnp.float32)
    p['td_w2'] = lin((H_DIM, H_DIM)); p['td_b2'] = jnp.zeros((1, H_DIM), jnp.float32)
    p['td_g2'] = jnp.ones((1, H_DIM), jnp.float32); p['td_be2'] = jnp.zeros((1, H_DIM), jnp.float32)
    p['td_w3'] = lin((H_DIM, F_DIM)); p['td_b3'] = jnp.zeros((1, F_DIM), jnp.float32)
    # diffusion_net: Linear(F,H/2) ReLU Linear(H/2,1) Sigmoid
    p['df_w1'] = lin((F_DIM, H2_DIM)); p['df_b1'] = jnp.zeros((1, H2_DIM), jnp.float32)
    p['df_w2'] = lin((H2_DIM, 1)); p['df_b2'] = jnp.zeros((1, 1), jnp.float32)
    # GraphLaplacian.edge_weight_net: Linear(1,32) ReLU Linear(32,1) Sigmoid
    p['ew_w1'] = lin((1, 32)); p['ew_b1'] = jnp.zeros((32,), jnp.float32)
    p['ew_w2'] = lin((32, 1)); p['ew_b2'] = jnp.zeros((1,), jnp.float32)
    # edge_predictor (unused here, see TODO above)
    p['ep_w1'] = lin((2 * F_DIM + 3, H_DIM)); p['ep_b1'] = jnp.zeros((H_DIM,), jnp.float32)
    p['ep_w2'] = lin((H_DIM, 64)); p['ep_b2'] = jnp.zeros((64,), jnp.float32)
    p['ep_w3'] = lin((64, 1)); p['ep_b3'] = jnp.zeros((1,), jnp.float32)
    return p


def prepare_kernel_params(p):
    """Cast matmul weights to bf16 and pack per-vector params into (8, W) tiles."""
    bf = lambda w: w.astype(jnp.bfloat16)

    enc_pH = jnp.zeros((8, H_DIM), jnp.float32)
    enc_pH = (enc_pH.at[0].set(p['fe_b1'][0]).at[1].set(p['fe_g1'][0])
                    .at[2].set(p['fe_be1'][0]))
    enc_pF = jnp.zeros((8, F_DIM), jnp.float32)
    enc_pF = (enc_pF.at[0].set(p['fe_b2'][0]).at[1].set(p['fe_g2'][0])
                    .at[2].set(p['fe_be2'][0]).at[3].set(p['ce_b'][0])
                    .at[4].set(p['ce_g'][0]).at[5].set(p['ce_be'][0]))

    ode_pH = jnp.zeros((8, H_DIM), jnp.float32)
    ode_pH = (ode_pH.at[0].set(p['td_b1'][0]).at[1].set(p['td_g1'][0])
                    .at[2].set(p['td_be1'][0]).at[3].set(p['td_b2'][0])
                    .at[4].set(p['td_g2'][0]).at[5].set(p['td_be2'][0]))
    ode_pF = jnp.zeros((8, F_DIM), jnp.float32)
    ode_pF = (ode_pF.at[0].set(p['td_b3'][0]).at[1].set(p['df_b1'][0])
                    .at[2].set(p['df_w2'][:, 0]).at[3, 0].set(p['df_b2'][0, 0]))

    kp = dict(p)
    kp.update(
        enc_fw1=bf(p['fe_w1']), enc_fw2=bf(p['fe_w2']), enc_cw=bf(p['ce_w']),
        enc_pH=enc_pH, enc_pF=enc_pF,
        ode_w1a=bf(p['td_w1a']), ode_w1b=bf(p['td_w1b']),
        ode_w2=bf(p['td_w2']), ode_w3=bf(p['td_w3']), ode_dw1=bf(p['df_w1']),
        ode_pH=ode_pH, ode_pF=ode_pF,
    )
    return kp


# =================================== main ===================================
if __name__ == "__main__":
    key = jax.random.PRNGKey(0)
    pkey, okey, posk, nfk, npk, eik, eak = jax.random.split(key, 7)

    params = prepare_kernel_params(init_params(pkey))

    observation = jax.random.normal(okey, (1, V_DIM), jnp.float32)
    position = jax.random.normal(posk, (3,), jnp.float32)

    node_features = 0.1 * jax.random.normal(nfk, (N_NODES, F_DIM), jnp.float32)
    node_positions = jax.random.normal(npk, (N_NODES, 3), jnp.float32)
    src = jax.random.randint(eik, (N_EDGES,), 0, N_NODES)
    dst = jax.random.randint(jax.random.fold_in(eik, 1), (N_EDGES,), 0, N_NODES)
    edge_index = jnp.stack([src, dst]).astype(jnp.int32)
    edge_attr = jax.random.uniform(eak, (N_EDGES, 1), jnp.float32)

    graph_state = dict(node_features=node_features,
                       node_positions=node_positions,
                       edge_index=edge_index,
                       edge_attr=edge_attr,
                       last_update_time=0.0)

    new_state, query = forward(params, graph_state, observation, position,
                               current_time=1.0, num_steps=8)
    query = jax.block_until_ready(query)
    jax.block_until_ready(new_state['node_features'])

    assert query.shape == (F_DIM,)
    assert new_state['node_features'].shape == (N_NODES, F_DIM)
    assert bool(jnp.all(jnp.isfinite(query)))
    assert bool(jnp.all(jnp.isfinite(new_state['node_features'])))
    print("KERNEL_OK")
</pallas_src>

<mosaic_0001>
module attributes {stable_mosaic.version = 11 : i64} {
  func.func @encoder_kernel(%arg0: i32, %arg1: memref<1x128xf32, #tpu.memory_space<vmem>>, %arg2: memref<128x256xbf16, #tpu.memory_space<vmem>>, %arg3: memref<256x128xbf16, #tpu.memory_space<vmem>>, %arg4: memref<128x128xbf16, #tpu.memory_space<vmem>>, %arg5: memref<8x256xf32, #tpu.memory_space<vmem>>, %arg6: memref<8x128xf32, #tpu.memory_space<vmem>>, %arg7: memref<1x128xf32, #tpu.memory_space<vmem>>, %arg8: memref<1x128xf32, #tpu.memory_space<vmem>>) attributes {dimension_semantics = [#tpu.dimension_semantics<arbitrary>], iteration_bounds = array<i64: 1>, scalar_prefetch = 0 : i64, scratch_operands = 0 : i64, tpu.core_type = #tpu.core_type<tc>, window_params = [{pipeline_mode = #tpu.pipeline_mode<synchronous>, transform_indices = @transform_0, window_bounds = array<i64: 1, 128>}, {pipeline_mode = #tpu.pipeline_mode<synchronous>, transform_indices = @transform_1, window_bounds = array<i64: 128, 256>}, {pipeline_mode = #tpu.pipeline_mode<synchronous>, transform_indices = @transform_2, window_bounds = array<i64: 256, 128>}, {pipeline_mode = #tpu.pipeline_mode<synchronous>, transform_indices = @transform_3, window_bounds = array<i64: 128, 128>}, {pipeline_mode = #tpu.pipeline_mode<synchronous>, transform_indices = @transform_4, window_bounds = array<i64: 8, 256>}, {pipeline_mode = #tpu.pipeline_mode<synchronous>, transform_indices = @transform_5, window_bounds = array<i64: 8, 128>}, {pipeline_mode = #tpu.pipeline_mode<synchronous>, transform_indices = @transform_6, window_bounds = array<i64: 1, 128>}, {pipeline_mode = #tpu.pipeline_mode<synchronous>, transform_indices = @transform_7, window_bounds = array<i64: 1, 128>}]} {
    %c0 = arith.constant 0 : index
    %c0_0 = arith.constant 0 : index
    %0 = vector.load %arg5[%c0, %c0_0] : memref<8x256xf32, #tpu.memory_space<vmem>>, vector<8x256xf32>
    %c0_1 = arith.constant 0 : index
    %c0_2 = arith.constant 0 : index
    %1 = vector.load %arg6[%c0_1, %c0_2] : memref<8x128xf32, #tpu.memory_space<vmem>>, vector<8x128xf32>
    %2 = vector.extract_strided_slice %0 {offsets = [0, 0], sizes = [1, 256], strides = [1, 1]} : vector<8x256xf32> to vector<1x256xf32>
    %3 = vector.extract_strided_slice %0 {offsets = [1, 0], sizes = [1, 256], strides = [1, 1]} : vector<8x256xf32> to vector<1x256xf32>
    %4 = vector.extract_strided_slice %0 {offsets = [2, 0], sizes = [1, 256], strides = [1, 1]} : vector<8x256xf32> to vector<1x256xf32>
    %5 = vector.extract_strided_slice %1 {offsets = [0, 0], sizes = [1, 128], strides = [1, 1]} : vector<8x128xf32> to vector<1x128xf32>
    %6 = vector.extract_strided_slice %1 {offsets = [1, 0], sizes = [1, 128], strides = [1, 1]} : vector<8x128xf32> to vector<1x128xf32>
    %7 = vector.extract_strided_slice %1 {offsets = [2, 0], sizes = [1, 128], strides = [1, 1]} : vector<8x128xf32> to vector<1x128xf32>
    %8 = vector.extract_strided_slice %1 {offsets = [3, 0], sizes = [1, 128], strides = [1, 1]} : vector<8x128xf32> to vector<1x128xf32>
    %9 = vector.extract_strided_slice %1 {offsets = [4, 0], sizes = [1, 128], strides = [1, 1]} : vector<8x128xf32> to vector<1x128xf32>
    %10 = vector.extract_strided_slice %1 {offsets = [5, 0], sizes = [1, 128], strides = [1, 1]} : vector<8x128xf32> to vector<1x128xf32>
    %c0_3 = arith.constant 0 : index
    %c0_4 = arith.constant 0 : index
    %11 = vector.load %arg1[%c0_3, %c0_4] : memref<1x128xf32, #tpu.memory_space<vmem>>, vector<1x128xf32>
    %12 = arith.truncf %11 : vector<1x128xf32> to vector<1x128xbf16>
    %c0_5 = arith.constant 0 : index
    %c0_6 = arith.constant 0 : index
    %13 = vector.load %arg2[%c0_5, %c0_6] : memref<128x256xbf16, #tpu.memory_space<vmem>>, vector<128x256xbf16>
    %cst = arith.constant dense<0.000000e+00> : vector<1x256xf32>
    %14 = tpu.matmul %12, %13, %cst {dimension_numbers = #tpu.dot_dimension_numbers<[1], [0], [0], [1], [0, 0, 1, 1], [], []>} : vector<1x128xbf16>, vector<128x256xbf16>, vector<1x256xf32> -> vector<1x256xf32>
    %15 = arith.addf %14, %2 : vector<1x256xf32>
    %cst_7 = arith.constant dense<0.000000e+00> : vector<1xf32>
    %16 = vector.multi_reduction <add>, %15, %cst_7 [1] : vector<1x256xf32> to vector<1xf32>
    %17 = vector.shape_cast %16 : vector<1xf32> to vector<1x1xf32>
    %cst_8 = arith.constant 2.560000e+02 : f32
    %18 = vector.broadcast %cst_8 : f32 to vector<1x1xf32>
    %19 = arith.divf %17, %18 : vector<1x1xf32>
    %20 = vector.broadcast %19 : vector<1x1xf32> to vector<1x256xf32>
    %21 = arith.subf %15, %20 : vector<1x256xf32>
    %22 = arith.mulf %21, %21 : vector<1x256xf32>
    %cst_9 = arith.constant dense<0.000000e+00> : vector<1xf32>
    %23 = vector.multi_reduction <add>, %22, %cst_9 [1] : vector<1x256xf32> to vector<1xf32>
    %24 = vector.shape_cast %23 : vector<1xf32> to vector<1x1xf32>
    %cst_10 = arith.constant 2.560000e+02 : f32
    %25 = vector.broadcast %cst_10 : f32 to vector<1x1xf32>
    %26 = arith.divf %24, %25 : vector<1x1xf32>
    %27 = vector.broadcast %19 : vector<1x1xf32> to vector<1x256xf32>
    %28 = arith.subf %15, %27 : vector<1x256xf32>
    %cst_11 = arith.constant 9.99999974E-6 : f32
    %29 = vector.broadcast %cst_11 : f32 to vector<1x1xf32>
    %30 = arith.addf %26, %29 : vector<1x1xf32>
    %31 = math.rsqrt %30 : vector<1x1xf32>
    %32 = vector.broadcast %31 : vector<1x1xf32> to vector<1x256xf32>
    %33 = arith.mulf %28, %32 : vector<1x256xf32>
    %34 = arith.mulf %33, %3 : vector<1x256xf32>
    %35 = arith.addf %34, %4 : vector<1x256xf32>
    %cst_12 = arith.constant 0.000000e+00 : f32
    %36 = vector.broadcast %cst_12 : f32 to vector<1x256xf32>
    %37 = arith.maximumf %35, %36 : vector<1x256xf32>
    %38 = arith.truncf %37 : vector<1x256xf32> to vector<1x256xbf16>
    %c0_13 = arith.constant 0 : index
    %c0_14 = arith.constant 0 : index
    %39 = vector.load %arg3[%c0_13, %c0_14] : memref<256x128xbf16, #tpu.memory_space<vmem>>, vector<256x128xbf16>
    %cst_15 = arith.constant dense<0.000000e+00> : vector<1x128xf32>
    %40 = tpu.matmul %38, %39, %cst_15 {dimension_numbers = #tpu.dot_dimension_numbers<[1], [0], [0], [1], [0, 0, 1, 1], [], []>} : vector<1x256xbf16>, vector<256x128xbf16>, vector<1x128xf32> -> vector<1x128xf32>
    %41 = arith.addf %40, %5 : vector<1x128xf32>
    %cst_16 = arith.constant dense<0.000000e+00> : vector<1xf32>
    %42 = vector.multi_reduction <add>, %41, %cst_16 [1] : vector<1x128xf32> to vector<1xf32>
    %43 = vector.shape_cast %42 : vector<1xf32> to vector<1x1xf32>
    %cst_17 = arith.constant 1.280000e+02 : f32
    %44 = vector.broadcast %cst_17 : f32 to vector<1x1xf32>
    %45 = arith.divf %43, %44 : vector<1x1xf32>
    %46 = vector.broadcast %45 : vector<1x1xf32> to vector<1x128xf32>
    %47 = arith.subf %41, %46 : vector<1x128xf32>
    %48 = arith.mulf %47, %47 : vector<1x128xf32>
    %cst_18 = arith.constant dense<0.000000e+00> : vector<1xf32>
    %49 = vector.multi_reduction <add>, %48, %cst_18 [1] : vector<1x128xf32> to vector<1xf32>
    %50 = vector.shape_cast %49 : vector<1xf32> to vector<1x1xf32>
    %cst_19 = arith.constant 1.280000e+02 : f32
    %51 = vector.broadcast %cst_19 : f32 to vector<1x1xf32>
    %52 = arith.divf %50, %51 : vector<1x1xf32>
    %53 = vector.broadcast %45 : vector<1x1xf32> to vector<1x128xf32>
    %54 = arith.subf %41, %53 : vector<1x128xf32>
    %cst_20 = arith.constant 9.99999974E-6 : f32
    %55 = vector.broadcast %cst_20 : f32 to vector<1x1xf32>
    %56 = arith.addf %52, %55 : vector<1x1xf32>
    %57 = math.rsqrt %56 : vector<1x1xf32>
    %58 = vector.broadcast %57 : vector<1x1xf32> to vector<1x128xf32>
    %59 = arith.mulf %54, %58 : vector<1x128xf32>
    %60 = arith.mulf %59, %6 : vector<1x128xf32>
    %61 = arith.addf %60, %7 : vector<1x128xf32>
    %c0_21 = arith.constant 0 : index
    %c0_22 = arith.constant 0 : index
    %62 = vector.load %arg7[%c0_21, %c0_22] : memref<1x128xf32, #tpu.memory_space<vmem>>, vector<1x128xf32>
    tpu.vector_store %arg7[%c0_21, %c0_22], %61 {strides = array<i32>} : memref<1x128xf32, #tpu.memory_space<vmem>>, vector<1x128xf32>,
    %c0_23 = arith.constant 0 : index
    %c0_24 = arith.constant 0 : index
    %63 = vector.load %arg4[%c0_23, %c0_24] : memref<128x128xbf16, #tpu.memory_space<vmem>>, vector<128x128xbf16>
    %cst_25 = arith.constant dense<0.000000e+00> : vector<1x128xf32>
    %64 = tpu.matmul %12, %63, %cst_25 {dimension_numbers = #tpu.dot_dimension_numbers<[1], [0], [0], [1], [0, 0, 1, 1], [], []>} : vector<1x128xbf16>, vector<128x128xbf16>, vector<1x128xf32> -> vector<1x128xf32>
    %65 = arith.addf %64, %8 : vector<1x128xf32>
    %cst_26 = arith.constant dense<0.000000e+00> : vector<1xf32>
    %66 = vector.multi_reduction <add>, %65, %cst_26 [1] : vector<1x128xf32> to vector<1xf32>
    %67 = vector.shape_cast %66 : vector<1xf32> to vector<1x1xf32>
    %cst_27 = arith.constant 1.280000e+02 : f32
    %68 = vector.broadcast %cst_27 : f32 to vector<1x1xf32>
    %69 = arith.divf %67, %68 : vector<1x1xf32>
    %70 = vector.broadcast %69 : vector<1x1xf32> to vector<1x128xf32>
    %71 = arith.subf %65, %70 : vector<1x128xf32>
    %72 = arith.mulf %71, %71 : vector<1x128xf32>
    %cst_28 = arith.constant dense<0.000000e+00> : vector<1xf32>
    %73 = vector.multi_reduction <add>, %72, %cst_28 [1] : vector<1x128xf32> to vector<1xf32>
    %74 = vector.shape_cast %73 : vector<1xf32> to vector<1x1xf32>
    %cst_29 = arith.constant 1.280000e+02 : f32
    %75 = vector.broadcast %cst_29 : f32 to vector<1x1xf32>
    %76 = arith.divf %74, %75 : vector<1x1xf32>
    %77 = vector.broadcast %69 : vector<1x1xf32> to vector<1x128xf32>
    %78 = arith.subf %65, %77 : vector<1x128xf32>
    %cst_30 = arith.constant 9.99999974E-6 : f32
    %79 = vector.broadcast %cst_30 : f32 to vector<1x1xf32>
    %80 = arith.addf %76, %79 : vector<1x1xf32>
    %81 = math.rsqrt %80 : vector<1x1xf32>
    %82 = vector.broadcast %81 : vector<1x1xf32> to vector<1x128xf32>
    %83 = arith.mulf %78, %82 : vector<1x128xf32>
    %84 = arith.mulf %83, %9 : vector<1x128xf32>
    %85 = arith.addf %84, %10 : vector<1x128xf32>
    %c0_31 = arith.constant 0 : index
    %c0_32 = arith.constant 0 : index
    %86 = vector.load %arg8[%c0_31, %c0_32] : memref<1x128xf32, #tpu.memory_space<vmem>>, vector<1x128xf32>
    tpu.vector_store %arg8[%c0_31, %c0_32], %85 {strides = array<i32>} : memref<1x128xf32, #tpu.memory_space<vmem>>, vector<1x128xf32>,
    return
  }
  func.func @transform_0(%arg0: i32) -> (i32, i32) {
    %c0_i32 = arith.constant 0 : i32
    %c0_i32_0 = arith.constant 0 : i32
    %c0_i32_1 = arith.constant 0 : i32
    return %c0_i32, %c0_i32_0 : i32, i32
  }
  func.func @transform_1(%arg0: i32) -> (i32, i32) {
    %c0_i32 = arith.constant 0 : i32
    %c0_i32_0 = arith.constant 0 : i32
    %c0_i32_1 = arith.constant 0 : i32
    return %c0_i32, %c0_i32_0 : i32, i32
  }
  func.func @transform_2(%arg0: i32) -> (i32, i32) {
    %c0_i32 = arith.constant 0 : i32
    %c0_i32_0 = arith.constant 0 : i32
    %c0_i32_1 = arith.constant 0 : i32
    return %c0_i32, %c0_i32_0 : i32, i32
  }
  func.func @transform_3(%arg0: i32) -> (i32, i32) {
    %c0_i32 = arith.constant 0 : i32
    %c0_i32_0 = arith.constant 0 : i32
    %c0_i32_1 = arith.constant 0 : i32
    return %c0_i32, %c0_i32_0 : i32, i32
  }
  func.func @transform_4(%arg0: i32) -> (i32, i32) {
    %c0_i32 = arith.constant 0 : i32
    %c0_i32_0 = arith.constant 0 : i32
    %c0_i32_1 = arith.constant 0 : i32
    return %c0_i32, %c0_i32_0 : i32, i32
  }
  func.func @transform_5(%arg0: i32) -> (i32, i32) {
    %c0_i32 = arith.constant 0 : i32
    %c0_i32_0 = arith.constant 0 : i32
    %c0_i32_1 = arith.constant 0 : i32
    return %c0_i32, %c0_i32_0 : i32, i32
  }
  func.func @transform_6(%arg0: i32) -> (i32, i32) {
    %c0_i32 = arith.constant 0 : i32
    %c0_i32_0 = arith.constant 0 : i32
    %c0_i32_1 = arith.constant 0 : i32
    return %c0_i32, %c0_i32_0 : i32, i32
  }
  func.func @transform_7(%arg0: i32) -> (i32, i32) {
    %c0_i32 = arith.constant 0 : i32
    %c0_i32_0 = arith.constant 0 : i32
    %c0_i32_1 = arith.constant 0 : i32
    return %c0_i32, %c0_i32_0 : i32, i32
  }
}

</mosaic_0001>

<bundles_post_ra>
// kernel: tpu_custom_call.1
= control target key start
LH: loop header
LB: loop body
LE: loop exit
PB: predicated region body
PF: predicated region fallthrough
CT: control target
= control target key end

     0   :  { %13 = vsyncpa [#allocation3], 0  ;;  %s1049_s0 = inlined_call_operand.hbm [shape: f32[1,128], index: 0, kind: input, shape index: {}]   ;;  %s1050_s1 = inlined_call_operand.hbm [shape: bf16[128,256], index: 1, kind: input, shape index: {}]   ;;  %s1051_s2 = inlined_call_operand.hbm [shape: bf16[256,128], index: 2, kind: input, shape index: {}]   ;;  %s1052_s3 = inlined_call_operand.hbm [shape: bf16[128,128], index: 3, kind: input, shape index: {}]   ;;  %s1053_s4 = inlined_call_operand.hbm [shape: f32[8,256], index: 4, kind: input, shape index: {}]   ;;  %s1054_s5 = inlined_call_operand.vmem [shape: f32[8,128], index: 5, kind: input, shape index: {}]   ;;  %s1055_s6 = inlined_call_operand.hbm [shape: f32[1,128], index: 6, kind: output, shape index: {0}]   ;;  %s1056_s7 = inlined_call_operand.hbm [shape: f32[1,128], index: 7, kind: output, shape index: {1}]  }
   0x1   :  { %14 = vsyncpa [#allocation6], 0 }
   0x2   :  { %15 = vsyncpa [#allocation9], 0 }
   0x3   :  { %16 = vsyncpa [#allocation4], 0 }
   0x4   :  { %17 = vsyncpa [#allocation13], 0  ;;  %s930_s24 = smov [#allocation5]  }
   0x5   :  { %s33_s25 = sshll.u32 %s930_s24, 4  ;;  %s34_s25 = int_to_ptr.vmem [resolvable:$true] %s33_s25 }
   0x6   :  { %s788_s26 = scalar_lea.vmem %s34_s25, 2048  ;;  %p793_p1 = scmp.lt.s32.totalorder %s34_s25, %s34_s25 }
   0x7   :  { %p789_p0 = scmp.ne.s32.totalorder %s34_s25, %s788_s26  ;;  %p794_p2 = scmp.lt.s32.totalorder %s788_s26, %s788_s26 }
   0x9   :  { %p795_p3 = por %p794_p2, %p793_p1 }
   0xb   :  { %p796_p4 = pnand %p795_p3, %p789_p0 }
   0xd   :  { %799 = shalt.err (!%p796_p4)
}
   0xe   :  { %s931_s27 = smov 128   ;;  %s932_s28 = smov 8  }
   0xf   :  { %39 = dma.hbm_to_vmem [thread:$0]  %s1050_s1, 2048, %s34_s25, [#allocation6], %s931_s27, %s931_s27, %s932_s28  }
  0x10   :  { %s933_s8 = smov [#allocation8]   ;;  %s934_s10 = smov [#allocation2]  }
  0x11   :  { %s57_s9 = sshll.u32 %s933_s8, 4  ;;  %s24_s11 = sshll.u32 %s934_s10, 4  ;;  %s58_s9 = int_to_ptr.vmem [resolvable:$true] %s57_s9  ;;  %s25_s11 = int_to_ptr.vmem [resolvable:$true] %s24_s11 }
  0x12   :  { %s808_s12 = scalar_lea.vmem %s58_s9, 1024  ;;  %p813_p6 = scmp.lt.s32.totalorder %s58_s9, %s58_s9 }
  0x13   :  { %p809_p5 = scmp.ne.s32.totalorder %s58_s9, %s808_s12  ;;  %p814_p7 = scmp.lt.s32.totalorder %s808_s12, %s808_s12 }
  0x15   :  { %p815_p8 = por %p814_p7, %p813_p6 }
  0x17   :  { %p816_p9 = pnand %p815_p8, %p809_p5 }
  0x19   :  { %819 = shalt.err (!%p816_p9)
}
  0x1a   :  { %s935_s13 = smov 64   ;;  %s936_s14 = smov 4  }
  0x1b   :  { %63 = dma.hbm_to_vmem [thread:$0]  %s1052_s3, 1024, %s58_s9, [#allocation9], %s935_s13, %s935_s13, %s936_s14  }
  0x1c   :  { %s828_s1 = scalar_lea.vmem %s25_s11, 16  ;;  %s832_s17 = scalar_lea.vmem %s25_s11, 32 }
  0x1d   :  { %p829_p10 = scmp.ne.s32.totalorder %s25_s11, %s828_s1  ;;  %p833_p11 = scmp.lt.s32.totalorder %s25_s11, %s25_s11 }
  0x1e   :  { %p834_p12 = scmp.lt.s32.totalorder %s832_s17, %s828_s1 }
  0x20   :  { %p835_p13 = por %p834_p12, %p833_p11 }
  0x22   :  { %p836_p0 = pnand %p835_p13, %p829_p10 }
  0x24   :  { %839 = shalt.err (!%p836_p0)
}
  0x25   :  { %27 = dma.hbm_to_vmem [thread:$0]  %s1049_s0, 16, %s25_s11, [#allocation3]  }
  0x26   :  { %s937_s20 = smov [#allocation7]   ;;  %s938_s22 = smov [#allocation10]  }
  0x27   :  { %s45_s21 = sshll.u32 %s937_s20, 4  ;;  %s70_s23 = sshll.u32 %s938_s22, 4  ;;  %s46_s21 = int_to_ptr.vmem [resolvable:$true] %s45_s21  ;;  %s71_s23 = int_to_ptr.vmem [resolvable:$true] %s70_s23 }
  0x28   :  { %s848_s24 = scalar_lea.vmem %s46_s21, 2048  ;;  %p853_p2 = scmp.lt.s32.totalorder %s46_s21, %s46_s21 }
  0x29   :  { %p849_p1 = scmp.ne.s32.totalorder %s46_s21, %s848_s24  ;;  %p854_p3 = scmp.lt.s32.totalorder %s848_s24, %s848_s24 }
  0x2b   :  { %p855_p4 = por %p854_p3, %p853_p2 }
  0x2d   :  { %p856_p5 = pnand %p855_p4, %p849_p1 }
  0x2f   :  { %859 = shalt.err (!%p856_p5)
}
  0x30   :  { %51 = dma.hbm_to_vmem [thread:$0]  %s1051_s2, 2048, %s46_s21, [#allocation6], %s935_s13, %s935_s13, %s936_s14  }
  0x31   :  { %s868_s26 = scalar_lea.vmem %s71_s23, 256  ;;  %p873_p7 = scmp.lt.s32.totalorder %s71_s23, %s71_s23 }
  0x32   :  { %p869_p6 = scmp.ne.s32.totalorder %s71_s23, %s868_s26  ;;  %p874_p8 = scmp.lt.s32.totalorder %s868_s26, %s868_s26 }
  0x34   :  { %p875_p9 = por %p874_p8, %p873_p7 }
  0x36   :  { %p876_p10 = pnand %p875_p9, %p869_p6 }
  0x38   :  { %879 = shalt.err (!%p876_p10)
}
  0x39   :  { %73 = dma.hbm_to_vmem [thread:$0]  %s1053_s4, 256, %s71_s23, [#allocation9]  }
  0x3a   :  { %920 = dma.done.wait [#allocation3], 16  }
  0x3b   :  { %921 = vsyncadd [#allocation3], 4294967280 }
  0x3c   :  { %922 = dma.done.wait [#allocation6], 4096  }
  0x3d   :  { %923 = vsyncadd [#allocation6], 4294963200 }
  0x3e   :  { %924 = dma.done.wait [#allocation9], 1280  }
  0x3f   :  { %925 = vsyncadd [#allocation9], 4294966016  ;;  %v939_v0 = vmov 0   ;;  %v726_v1 = vld [vmem:[#allocation5 + $0x74] ss:$8 sps:$4 sm:$0xff]   ;;  %v1002_v19 = vld [vmem:[#allocation10] sm:$0xff] }
  0x40   :  { %225 = vmatprep.mubr.bf16.mxu0 %v939_v0  ;;  %v728_v2 = vld [vmem:[#allocation5 + $0x70] ss:$8 sps:$4 sm:$0xff]   ;;  %193 = vmatprep.subr.bf16.mxu0 %v726_v1  ;;  %v729_v3 = vld [vmem:[#allocation5 + $0x64] ss:$8 sps:$4 sm:$0xff]   ;;  %v731_v4 = vld [vmem:[#allocation5 + $0x60] ss:$8 sps:$4 sm:$0xff]  }
  0x41   :  { %194 = vmatpush1.bf16.msra.mxu0 %v728_v2  ;;  %v732_v5 = vld [vmem:[#allocation5 + $0x54] ss:$8 sps:$4 sm:$0xff]   ;;  %v734_v6 = vld [vmem:[#allocation5 + $0x50] ss:$8 sps:$4 sm:$0xff]   ;;  %v735_v7 = vld [vmem:[#allocation5 + $0x44] ss:$8 sps:$4 sm:$0xff]  }
  0x42   :  { %195 = vmatprep.subr.bf16.mxu0 %v729_v3  ;;  %v737_v8 = vld [vmem:[#allocation5 + $0x40] ss:$8 sps:$4 sm:$0xff]   ;;  %v738_v9 = vld [vmem:[#allocation5 + $0x34] ss:$8 sps:$4 sm:$0xff]   ;;  %v740_v10 = vld [vmem:[#allocation5 + $0x30] ss:$8 sps:$4 sm:$0xff]  }
  0x43   :  { %v741_v11 = vld [vmem:[#allocation5 + $0x24] ss:$8 sps:$4 sm:$0xff]   ;;  %v743_v12 = vld [vmem:[#allocation5 + $0x20] ss:$8 sps:$4 sm:$0xff]   ;;  %v744_v13 = vld [vmem:[#allocation5 + $0x14] ss:$8 sps:$4 sm:$0xff]  }
  0x44   :  { %v746_v14 = vld [vmem:[#allocation5 + $0x10] ss:$8 sps:$4 sm:$0xff]   ;;  %v747_v15 = vld [vmem:[#allocation5 + $0x4] ss:$8 sps:$4 sm:$0xff]   ;;  %v749_v16 = vld [vmem:[#allocation5] ss:$8 sps:$4 sm:$0xff]  }
  0x45   :  { %196 = vmatpush1.bf16.msra.mxu0 %v731_v4  ;;  %v95_v17 = vld [vmem:[#allocation2] sm:$0x1]  ;;  %v1004_v21 = vld [vmem:[#allocation10 + $0x8] sm:$0xff]  ;;  %vm234_vm0 = vcmask 1040384   ;;  %v940_v32 = vmov 0.0   ;;  %v753_v43 = vld [vmem:[#allocation7 + $0x70] sm:$0xff]  }
  0x46   :  { %197 = vmatprep.subr.bf16.mxu0 %v732_v5  ;;  %v999_v18 = vpack.c.bf16 %v95_v17, %v95_v17  ;;  %v750_v30 = vld [vmem:[#allocation7 + $0x78] sm:$0xff]   ;;  %v754_v44 = vld [vmem:[#allocation7 + $0x30] sm:$0xff]   ;;  %v756_v46 = vld [vmem:[#allocation7 + $0x68] sm:$0xff]   ;;  %vm941_vm1 = vmmov 0   ;;  %v258_v3 = vrot.slane %v1002_v19, 1  ;;  %v259_v4 = vrot.slane %v1004_v21, 1 }
  0x47   :  { %v751_v31 = vld [vmem:[#allocation7 + $0x38] sm:$0xff]   ;;  %661 = vmatprep.subr.bf16.mxu1 %v750_v30  ;;  %v755_v45 = vld [vmem:[#allocation8 + $0x30] sm:$0xff]   ;;  %v757_v47 = vld [vmem:[#allocation7 + $0x28] sm:$0xff]   ;;  %s943_s29 = smov [#allocation12]  }
  0x48   :  { %662 = vmatpush3.bf16.msra.mxu1 %v751_v31  ;;  %v752_v42 = vld [vmem:[#allocation8 + $0x38] sm:$0xff]   ;;  %v758_v48 = vld [vmem:[#allocation8 + $0x28] sm:$0xff]   ;;  %v759_v49 = vld [vmem:[#allocation7 + $0x60] sm:$0xff]   ;;  %s606_s30 = sshll.u32 %s943_s29, 4  ;;  %s607_s30 = int_to_ptr.vmem [resolvable:$true] %s606_s30 }
  0x49   :  { %198 = vmatpush1.bf16.msra.mxu0 %v734_v6  ;;  %663 = vmatprep.subr.bf16.mxu1 %v753_v43  ;;  %v760_v50 = vld [vmem:[#allocation7 + $0x20] sm:$0xff]   ;;  %v762_v51 = vld [vmem:[#allocation7 + $0x58] sm:$0xff]   ;;  %v765_v54 = vld [vmem:[#allocation7 + $0x50] sm:$0xff]   ;;  %v264_v6 = vrot.slane %v1002_v19, 2 }
  0x4a   :  { %199 = vmatprep.subr.bf16.mxu0 %v735_v7  ;;  %v761_v52 = vld [vmem:[#allocation8 + $0x20] sm:$0xff]   ;;  %v763_v53 = vld [vmem:[#allocation7 + $0x18] sm:$0xff]   ;;  %v766_v56 = vld [vmem:[#allocation7 + $0x10] sm:$0xff]  }
  0x4b   :  { %v764_v55 = vld [vmem:[#allocation8 + $0x18] sm:$0xff]   ;;  %v768_v57 = vld [vmem:[#allocation7 + $0x48] sm:$0xff]   ;;  %v767_v58 = vld [vmem:[#allocation8 + $0x10] sm:$0xff]  }
  0x4c   :  { %664 = vmatpush3.bf16.msra.mxu1 %v754_v44  ;;  %v769_v59 = vld [vmem:[#allocation7 + $0x8] sm:$0xff]   ;;  %v771_v60 = vld [vmem:[#allocation7 + $0x40] sm:$0xff]  }
  0x4d   :  { %200 = vmatpush1.bf16.msra.mxu0 %v737_v8  ;;  %665 = vmatprep.subr.bf16.mxu1 %v756_v46  ;;  %v770_v61 = vld [vmem:[#allocation8 + $0x8] sm:$0xff]   ;;  %v772_v62 = vld [vmem:[#allocation7] sm:$0xff]   ;;  %v265_v8 = vrot.slane %v1004_v21, 2 }
  0x4e   :  { %201 = vmatprep.subr.bf16.mxu0 %v738_v9  ;;  %v773_v63 = vld [vmem:[#allocation8] sm:$0xff]  }
  0x50   :  { %666 = vmatpush3.bf16.msra.mxu1 %v757_v47 }
  0x51   :  { %202 = vmatpush1.bf16.msra.mxu0 %v740_v10  ;;  %667 = vmatprep.subr.bf16.mxu1 %v759_v49 }
  0x52   :  { %203 = vmatprep.subr.bf16.mxu0 %v741_v11 }
  0x54   :  { %668 = vmatpush3.bf16.msra.mxu1 %v760_v50 }
  0x55   :  { %204 = vmatpush1.bf16.msra.mxu0 %v743_v12  ;;  %669 = vmatprep.subr.bf16.mxu1 %v762_v51 }
  0x56   :  { %205 = vmatprep.subr.bf16.mxu0 %v744_v13 }
  0x58   :  { %670 = vmatpush3.bf16.msra.mxu1 %v763_v53 }
  0x59   :  { %206 = vmatpush1.bf16.msra.mxu0 %v746_v14  ;;  %671 = vmatprep.subr.bf16.mxu1 %v765_v54 }
  0x5a   :  { %207 = vmatprep.subr.bf16.mxu0 %v747_v15 }
  0x5c   :  { %672 = vmatpush3.bf16.msra.mxu1 %v766_v56 }
  0x5d   :  { %208 = vmatpush1.bf16.msra.mxu0 %v749_v16  ;;  %673 = vmatprep.subr.bf16.mxu1 %v768_v57 }
  0x5e   :  { %692 = vmatprep.subr.bf16.mxu0 %v940_v32 }
  0x60   :  { %226 = vmatmul.mubr.bf16.vlgmr.msra.gmra.mxu0 %v999_v18  ;;  %674 = vmatpush3.bf16.msra.mxu1 %v769_v59 }
  0x61   :  { %693 = vmatpush3.bf16.msra.mxu0 %v752_v42  ;;  %675 = vmatprep.subr.bf16.mxu1 %v771_v60 }
  0x62   :  { %694 = vmatprep.subr.bf16.mxu0 %v940_v32  ;;  %708 = vmatprep.mubr.msk.bf16.mxu0 %vm941_vm1, %v940_v32 }
  0x64   :  { %676 = vmatpush3.bf16.msra.mxu1 %v772_v62 }
  0x65   :  { %695 = vmatpush3.bf16.msra.mxu0 %v755_v45 }
  0x66   :  { %696 = vmatprep.subr.bf16.mxu0 %v940_v32 }
  0x69   :  { %697 = vmatpush3.bf16.msra.mxu0 %v758_v48 }
  0x6a   :  { %698 = vmatprep.subr.bf16.mxu0 %v940_v32 }
  0x6d   :  { %699 = vmatpush3.bf16.msra.mxu0 %v761_v52 }
  0x6e   :  { %700 = vmatprep.subr.bf16.mxu0 %v940_v32 }
  0x71   :  { %701 = vmatpush3.bf16.msra.mxu0 %v764_v55 }
  0x72   :  { %702 = vmatprep.subr.bf16.mxu0 %v940_v32 }
  0x75   :  { %703 = vmatpush3.bf16.msra.mxu0 %v767_v58 }
  0x76   :  { %704 = vmatprep.subr.bf16.mxu0 %v940_v32 }
  0x79   :  { %705 = vmatpush3.bf16.msra.mxu0 %v770_v61 }
  0x7a   :  { %706 = vmatprep.subr.bf16.mxu0 %v940_v32 }
  0x7d   :  { %707 = vmatpush3.bf16.msra.mxu0 %v773_v63 }
  0x80   :  { %709 = vmatmul.mubr.bf16.vlgmr.msra.gmra.mxu0 %v999_v18 }
 0x120   :  { %v227_v20 = vpop.f32.mrf.mxu0 }
 0x121   :  { %v228_v22 = vadd.f32 %v227_v20, %v1002_v19 }
 0x122   :  { %v229_v23 = vpop.f32.mrf.mxu0 }
 0x123   :  { %v230_v24 = vadd.f32 %v229_v23, %v1004_v21  ;;  %v235_v26 = vsel %vm234_vm0, %v228_v22, 0.0  ;;  %v94_v21 = vld [vmem:[%s1054_s5] sm:$0xff]  ;;  %s942_s5 = smov [#allocation11]  }
 0x124   :  { %v231_v25 = vpop.f32.mrf.mxu0  ;;  %v457_v49 = vrot.slane %v94_v21, 1  ;;  %v460_v52 = vrot.slane %v94_v21, 2  ;;  %s596_s28 = sshll.u32 %s942_s5, 4  ;;  %v583_v54 = vrot.slane %v94_v21, 4  ;;  %v586_v58 = vrot.slane %v94_v21, 5  ;;  %s597_s28 = int_to_ptr.vmem [resolvable:$true] %s596_s28 }
 0x125   :  { %v236_v27 = vsel %vm234_vm0, %v230_v24, 0.0  ;;  %s880_s8 = scalar_lea.vmem %s597_s28, 16  ;;  %s884_s9 = scalar_lea.vmem %s597_s28, 32 }
 0x126   :  { %v232_v28 = vpop.f32.mrf.mxu0  ;;  %v237_v29 = vadd.f32 %v236_v27, %v235_v26  ;;  %p881_p11 = scmp.ne.s32.totalorder %s597_s28, %s880_s8  ;;  %p885_p12 = scmp.lt.s32.totalorder %s597_s28, %s597_s28 }
 0x127   :  { %p886_p13 = scmp.lt.s32.totalorder %s884_s9, %s880_s8 }
 0x128   :  { %238 = vadd.xlane.f32.xlu0 %v237_v29 }
 0x129   :  { %p887_p0 = por %p886_p13, %p885_p12 }
 0x12b   :  { %p888_p1 = pnand %p887_p0, %p881_p11 }
 0x140   :  { %v564_v18 = vpop.f32.mrf.mxu0 }
 0x142   :  { %v710_v20 = vpop.f32.mrf.mxu0 }
 0x1b1   :  { %v239_v33 = vpop.xlane.xlu0 %238 }
 0x1b2   :  { %v241_v34 = vmul.f32 0.00390625, %v239_v33 }
 0x1b4   :  { %v1011_v35 = vsub.f32 %v228_v22, %v241_v34  ;;  %v1013_v36 = vsub.f32 %v230_v24, %v241_v34  ;;  %v567_v22 = vpop.f32.mrf.mxu0  ;;  %v528_v24 = vrot.slane %v94_v21, 3 }
 0x1b6   :  { %v244_v37 = vmul.f32 %v1011_v35, %v1011_v35  ;;  %v245_v38 = vmul.f32 %v1013_v36, %v1013_v36  ;;  %v711_v19 = vpop.f32.mrf.mxu0  ;;  %v565_v28 = vadd.f32 %v564_v18, %v528_v24 }
 0x1b8   :  { %v246_v39 = vsel %vm234_vm0, %v244_v37, 0.0  ;;  %v247_v40 = vsel %vm234_vm0, %v245_v38, 0.0  ;;  %v570_v32 = vsel %vm234_vm0, %v565_v28, 0.0 }
 0x1b9   :  { %v248_v41 = vadd.f32 %v247_v40, %v246_v39 }
 0x1bb   :  { %249 = vadd.xlane.f32.xlu0 %v248_v41 }
 0x244   :  { %v250_v0 = vpop.xlane.xlu0 %249 }
 0x245   :  { %v251_v1 = vmul.f32 0.00390625, %v250_v0 }
 0x247   :  { %v252_v2 = vadd.f32 1e-05, %v251_v1 }
 0x249   :  { %774 = vrsqrt.f32 %v252_v2 }
 0x256   :  { %v775_v5 = vpop.eup %774 }
 0x257   :  { %v255_v7 = vmul.f32 %v775_v5, %v1013_v36  ;;  %v254_v9 = vmul.f32 %v775_v5, %v1011_v35 }
 0x259   :  { %v263_v10 = vmul.f32 %v259_v4, %v255_v7  ;;  %v262_v11 = vmul.f32 %v258_v3, %v254_v9 }
 0x25b   :  { %v269_v12 = vadd.f32 %v265_v8, %v263_v10  ;;  %v268_v13 = vadd.f32 %v264_v6, %v262_v11 }
 0x25d   :  { %v271_v14 = vmax.f32 %v269_v12, 0.0  ;;  %v270_v15 = vmax.f32 %v268_v13, 0.0 }
 0x25f   :  { %v273_v16 = vpack.c.bf16 %v271_v14, %v271_v14  ;;  %v272_v17 = vpack.c.bf16 %v270_v15, %v270_v15 }
 0x261   :  { %434 = vmatprep.mubr.bf16.mxu1 %v273_v16 }
 0x262   :  { %435 = vmatmul.mubr.bf16.vlgmr.msra.gmra.mxu1 %v272_v17 }
 0x322   :  { %v677_v23 = vpop.f32.mrf.mxu1 }
 0x324   :  { %v678_v25 = vpop.f32.mrf.mxu1 }
 0x325   :  { %v679_v26 = vadd.f32 %v678_v25, %v677_v23 }
 0x326   :  { %v680_v27 = vpop.f32.mrf.mxu1 }
 0x327   :  { %v437_v29 = vadd.f32 %v679_v26, %v94_v21 }
 0x328   :  { %v681_v30 = vpop.f32.mrf.mxu1 }
 0x329   :  { %v442_v31 = vsel %vm234_vm0, %v437_v29, 0.0 }
 0x32a   :  { %443 = vadd.xlane.f32.xlu1 %v442_v31 }
 0x32e   :  { %571 = vadd.xlane.f32.xlu1 %v570_v32 }
 0x3b3   :  { %v444_v33 = vpop.xlane.xlu1 %443 }
 0x3b4   :  { %v446_v34 = vmul.f32 0.0078125, %v444_v33 }
 0x3b6   :  { %v447_v35 = vsub.f32 %v437_v29, %v446_v34 }
 0x3b7   :  { %v572_v36 = vpop.xlane.xlu1 %571 }
 0x3b8   :  { %v573_v37 = vmul.f32 0.0078125, %v572_v36  ;;  %v448_v38 = vmul.f32 %v447_v35, %v447_v35 }
 0x3ba   :  { %v574_v39 = vsub.f32 %v565_v28, %v573_v37  ;;  %v449_v40 = vsel %vm234_vm0, %v448_v38, 0.0 }
 0x3bb   :  { %450 = vadd.xlane.f32.xlu0 %v449_v40 }
 0x3bc   :  { %v575_v41 = vmul.f32 %v574_v39, %v574_v39 }
 0x3be   :  { %v576_v42 = vsel %vm234_vm0, %v575_v41, 0.0 }
 0x3bf   :  { %577 = vadd.xlane.f32.xlu1 %v576_v42 }
 0x444   :  { %v451_v43 = vpop.xlane.xlu0 %450 }
 0x445   :  { %v452_v44 = vmul.f32 0.0078125, %v451_v43 }
 0x447   :  { %v453_v45 = vadd.f32 1e-05, %v452_v44 }
 0x448   :  { %v578_v46 = vpop.xlane.xlu1 %577 }
 0x449   :  { %776 = vrsqrt.f32 %v453_v45  ;;  %v579_v47 = vmul.f32 0.0078125, %v578_v46 }
 0x44b   :  { %v580_v48 = vadd.f32 1e-05, %v579_v47 }
 0x44d   :  { %778 = vrsqrt.f32 %v580_v48 }
 0x456   :  { %v777_v50 = vpop.eup %776 }
 0x457   :  { %v455_v51 = vmul.f32 %v777_v50, %v447_v35 }
 0x459   :  { %v459_v53 = vmul.f32 %v457_v49, %v455_v51 }
 0x45a   :  { %v779_v55 = vpop.eup %778 }
 0x45b   :  { %v462_v56 = vadd.f32 %v460_v52, %v459_v53  ;;  %v582_v57 = vmul.f32 %v779_v55, %v574_v39 }
 0x45d   :  { %463 = vst [vmem:[#allocation11] sm:$0x1] %v462_v56  ;;  %v585_v59 = vmul.f32 %v583_v54, %v582_v57 }
 0x45e   :  { %891 = shalt.err (!%p888_p1)
}
 0x45f   :  { %599 = dma.vmem_to_hbm [thread:$0]  %s597_s28, 16, %s1055_s6, [#allocation4]   ;;  %v588_v60 = vadd.f32 %v586_v58, %v585_v59 }
 0x460   :  { %s900_s12 = scalar_lea.vmem %s607_s30, 16  ;;  %s904_s13 = scalar_lea.vmem %s607_s30, 32 }
 0x461   :  { %589 = vst [vmem:[#allocation12] sm:$0x1] %v588_v60  ;;  %p901_p2 = scmp.ne.s32.totalorder %s607_s30, %s900_s12  ;;  %p905_p3 = scmp.lt.s32.totalorder %s607_s30, %s607_s30 }
 0x462   :  { %p906_p4 = scmp.lt.s32.totalorder %s904_s13, %s900_s12 }
 0x464   :  { %p907_p5 = por %p906_p4, %p905_p3 }
 0x466   :  { %p908_p6 = pnand %p907_p5, %p901_p2 }
 0x468   :  { %911 = shalt.err (!%p908_p6)
}
 0x469   :  { %609 = dma.vmem_to_hbm [thread:$0]  %s607_s30, 16, %s1056_s7, [#allocation13]  }
 0x46a   :  { %926 = dma.done.wait [#allocation4], 16  }
 0x46b   :  { %927 = vsyncadd [#allocation4], 4294967280 }
 0x46c   :  { %928 = dma.done.wait [#allocation13], 16  }
 0x46d   :  { %929 = vsyncadd [#allocation13], 4294967280 }
 0x46e   :  { %616 = vsyncpa [#allocation3], 1 }
 0x46f   :  { %617 = vsyncpa [#allocation6], 1 }
 0x470   :  { %618 = vsyncpa [#allocation9], 1 }
 0x471   :  { %619 = vsyncpa [#allocation4], 1 }
 0x472   :  { %620 = vsyncpa [#allocation13], 1 }

</bundles_post_ra>
